<compile_context>
chip_gen: v7x
topology: tpu7x:2x2x1
jax: 0.10.0
libtpu: 0.0.40
codegen_flags: <defaults>
</compile_context>

<pallas_src>
import functools

import jax
import jax.numpy as jnp
from jax import lax
from jax.experimental import pallas as pl
from jax.experimental.pallas import tpu as pltpu


_NEG_INF = -1e30  # finite "minus infinity": avoids inf-inf NaN corner cases


def _round_up(x: int, m: int) -> int:
    return (x + m - 1) // m * m


def _contrastive_nll_kernel(h_ref, t_ref, o_ref, m_scr, l_scr, d_scr,
                            *, batch: int, padded: bool):
    i = pl.program_id(0)          # row block (hsi rows)        -- parallel
    j = pl.program_id(1)          # column block (text rows)    -- reduction
    nj = pl.num_programs(1)
    tm = h_ref.shape[0]
    tn = t_ref.shape[0]

    @pl.when(j == 0)
    def _init():
        m_scr[...] = jnp.full_like(m_scr, _NEG_INF)
        l_scr[...] = jnp.zeros_like(l_scr)
        d_scr[...] = jnp.zeros_like(d_scr)

    # h was pre-scaled by 1/temperature in the wrapper, so s already carries
    # the temperature.  bf16 x bf16 -> f32 accumulate on the MXU, no transpose.
    s = lax.dot_general(
        h_ref[...], t_ref[...],
        dimension_numbers=(((1,), (1,)), ((), ())),
        preferred_element_type=jnp.float32,
    )

    # Diagonal (label) logits live in column block j == i (tm == tn, identical
    # row/col padding).  Extract them from the SAME MXU result as the LSE path
    # so the label logit matches its softmax counterpart exactly.
    @pl.when(j == i)
    def _diag():
        rr = lax.broadcasted_iota(jnp.int32, (tm, tn), 0)
        cc = lax.broadcasted_iota(jnp.int32, (tm, tn), 1)
        d_scr[...] = jnp.sum(jnp.where(rr == cc, s, 0.0),
                             axis=-1, keepdims=True)

    def _lse_update(s_blk):
        m_prev = m_scr[...]
        m_new = jnp.maximum(m_prev, jnp.max(s_blk, axis=-1, keepdims=True))
        l_scr[...] = (jnp.exp(m_prev - m_new) * l_scr[...]
                      + jnp.sum(jnp.exp(s_blk - m_new), axis=-1, keepdims=True))
        m_scr[...] = m_new

    if padded:
        # All column padding lives in the last column block (B_pad - B < 128
        # <= tn), so only that block pays for the iota/compare/select mask.
        @pl.when(j < nj - 1)
        def _bulk():
            _lse_update(s)

        @pl.when(j == nj - 1)
        def _tail():
            col = j * tn + lax.broadcasted_iota(jnp.int32, (tm, tn), 1)
            _lse_update(jnp.where(col < batch, s, _NEG_INF))
    else:
        _lse_update(s)

    # Finalize after the last column block: per-row NLL -> block partial sum.
    @pl.when(j == nj - 1)
    def _finalize():
        lse = m_scr[...] + jnp.log(l_scr[...])          # (tm, 1)
        nll = lse - d_scr[...]                          # (tm, 1)
        if padded:
            row = i * tm + lax.broadcasted_iota(jnp.int32, (tm, 1), 0)
            nll = jnp.where(row < batch, nll, 0.0)
        # Lane-dense partial-sum store (one 128-lane row per row block).
        o_ref[...] = jnp.full((1, 1, 128), jnp.sum(nll), jnp.float32)


def contrastive_loss(hsi_embeddings, text_embeddings, temperature: float = 0.07):
    """Pallas TPU contrastive loss. Inputs: (B, D) each. Returns scalar f32."""
    assert hsi_embeddings.shape == text_embeddings.shape
    assert hsi_embeddings.ndim == 2
    B, D = hsi_embeddings.shape
    inv_temp = 1.0 / float(temperature)

    # Lane/sublane alignment: pad D to 128 (lane axis) and B to 128.
    B_pad = _round_up(B, 128)
    D_pad = _round_up(D, 128)

    # Tile choice: biggest column tile (fewest text-matrix HBM re-reads and
    # fewest grid steps) that still leaves gm >= 2 row blocks whenever
    # B_pad > 128, so the "parallel" row axis can split across v7x's 2 TCs.
    if B_pad % 512 == 0 and B_pad >= 1024:
        tile_b = 512
    elif B_pad % 256 == 0 and B_pad >= 512:
        tile_b = 256
    else:
        tile_b = 128
    gm = B_pad // tile_b
    gn = B_pad // tile_b
    padded = (B != B_pad)

    # MXU operands: bf16 when inputs arrive as f32; log-sum-exp math stays f32.
    # Cast + 1/temperature scale on h + pad all fuse into one wrapper pass, so
    # the kernel DMA moves half the bytes and no per-step temperature multiply
    # remains in-kernel.
    in_dtype = hsi_embeddings.dtype
    op_dtype = jnp.bfloat16 if in_dtype == jnp.float32 else in_dtype
    h = (hsi_embeddings.astype(jnp.float32) * inv_temp).astype(op_dtype)
    t = text_embeddings.astype(op_dtype)
    h = jnp.pad(h, ((0, B_pad - B), (0, D_pad - D)))
    t = jnp.pad(t, ((0, B_pad - B), (0, D_pad - D)))
    op_itemsize = jnp.dtype(op_dtype).itemsize

    # Explicit VMEM budget (v7x has only 64 MiB physical / 32 MiB default
    # scoped): h double buffer + t (up to triple) buffer + f32 s working set +
    # scratch, with headroom, capped at 48 MiB.
    vmem_need = (2 * tile_b * D_pad * op_itemsize
                 + 3 * tile_b * D_pad * op_itemsize
                 + 2 * tile_b * tile_b * 4
                 + 3 * tile_b * 4 + 128 * 4)
    vmem_limit = int(min(max(int(1.5 * vmem_need) + (4 << 20), 16 << 20), 48 << 20))

    # Text tile stream: one extra pipeline buffer when the column axis is long
    # enough that the default double buffer could leave the DMA exposed.
    t_index_map = lambda i, j: (j, 0)
    if gn >= 3:
        t_spec = pl.BlockSpec((tile_b, D_pad), t_index_map,
                              pipeline_mode=pl.Buffered(3))
    else:
        t_spec = pl.BlockSpec((tile_b, D_pad), t_index_map)

    kernel = functools.partial(_contrastive_nll_kernel, batch=B, padded=padded)

    per_block_nll = pl.pallas_call(
        kernel,
        out_shape=jax.ShapeDtypeStruct((gm, 1, 128), jnp.float32),
        grid_spec=pltpu.PrefetchScalarGridSpec(
            num_scalar_prefetch=0,
            grid=(gm, gn),
            in_specs=[
                # h row tile resident across the whole column (reduction) axis.
                pl.BlockSpec((tile_b, D_pad), lambda i, j: (i, 0)),
                t_spec,
            ],
            out_specs=pl.BlockSpec((1, 1, 128), lambda i, j: (i, 0, 0)),
            scratch_shapes=[
                pltpu.VMEM((tile_b, 1), jnp.float32),   # running max
                pltpu.VMEM((tile_b, 1), jnp.float32),   # running sum-exp
                pltpu.VMEM((tile_b, 1), jnp.float32),   # diagonal logits
            ],
        ),
        compiler_params=pltpu.CompilerParams(
            dimension_semantics=("parallel", "arbitrary"),
            vmem_limit_bytes=vmem_limit,
        ),
        cost_estimate=pl.CostEstimate(
            flops=2 * B_pad * B_pad * D_pad,
            transcendentals=B_pad * B_pad + B_pad,
            # h read once + text re-read once per row block + tiny output.
            bytes_accessed=(B_pad * D_pad * op_itemsize
                            + gm * B_pad * D_pad * op_itemsize
                            + gm * 128 * 4),
        ),
    )(h, t)

    # Mean over the TRUE batch (padded rows were excluded in-kernel).
    return jnp.sum(per_block_nll[:, 0, 0]) * (1.0 / B)


def _reference_loss(hsi, text, temperature=0.07):
    logits = (hsi.astype(jnp.float32) @ text.astype(jnp.float32).T) / temperature
    b = hsi.shape[0]
    logp = jax.nn.log_softmax(logits, axis=-1)
    return -jnp.mean(logp[jnp.arange(b), jnp.arange(b)])


if __name__ == "__main__":
    key = jax.random.PRNGKey(0)

    def _make(k, b, d):
        k1, k2 = jax.random.split(k)
        h = jax.random.normal(k1, (b, d), dtype=jnp.float32)
        t = jax.random.normal(k2, (b, d), dtype=jnp.float32)
        # L2-normalized embeddings (the usual contrastive-loss setting).
        h = h / jnp.linalg.norm(h, axis=-1, keepdims=True)
        t = t / jnp.linalg.norm(t, axis=-1, keepdims=True)
        return h, t

    ka, kb = jax.random.split(key)

    # Small shape (single tile; padded rows/cols exercised).
    hsi_embeddings, text_embeddings = _make(ka, 8, 32)
    loss = contrastive_loss(hsi_embeddings, text_embeddings, temperature=0.07)
    loss = jax.block_until_ready(loss)
    ref = _reference_loss(hsi_embeddings, text_embeddings, temperature=0.07)
    assert jnp.allclose(loss, ref, rtol=5e-2, atol=5e-2), (loss, ref)

    # Multi-block shape (2x2 grid: online LSE across column blocks, off-origin
    # diagonal block, megacore-shardable row axis, last-block padding mask).
    h2, t2 = _make(kb, 200, 192)
    loss2 = jax.block_until_ready(contrastive_loss(h2, t2, temperature=0.07))
    ref2 = _reference_loss(h2, t2, temperature=0.07)
    assert jnp.allclose(loss2, ref2, rtol=5e-2, atol=5e-2), (loss2, ref2)

    print("KERNEL_OK")
</pallas_src>

<mosaic_0001>
module attributes {stable_mosaic.version = 11 : i64} {
  func.func @_contrastive_nll_kernel(%arg0: i32, %arg1: i32, %arg2: memref<128x128xbf16, #tpu.memory_space<vmem>>, %arg3: memref<128x128xbf16, #tpu.memory_space<vmem>>, %arg4: memref<1x1x128xf32, #tpu.memory_space<vmem>>, %arg5: memref<128x1xf32, #tpu.memory_space<vmem>>, %arg6: memref<128x1xf32, #tpu.memory_space<vmem>>, %arg7: memref<128x1xf32, #tpu.memory_space<vmem>>) attributes {dimension_semantics = [#tpu.dimension_semantics<parallel>, #tpu.dimension_semantics<arbitrary>], iteration_bounds = array<i64: 1, 1>, scalar_prefetch = 0 : i64, scratch_operands = 3 : i64, tpu.core_type = #tpu.core_type<tc>, window_params = [{transform_indices = @transform_0, window_bounds = array<i64: 128, 128>}, {transform_indices = @transform_1, window_bounds = array<i64: 128, 128>}, {transform_indices = @transform_2, window_bounds = array<i64: 1, 1, 128>}]} {
    %c0_i32 = arith.constant 0 : i32
    %0 = arith.cmpi eq, %arg1, %c0_i32 : i32
    %1 = arith.extui %0 : i1 to i32
    %c0_i32_0 = arith.constant 0 : i32
    %2 = arith.cmpi ne, %1, %c0_i32_0 : i32
    scf.if %2 {
      %cst_11 = arith.constant -1.000000e+30 : f32
      %18 = vector.broadcast %cst_11 : f32 to vector<128x1xf32>
      %c0_12 = arith.constant 0 : index
      %c0_13 = arith.constant 0 : index
      %19 = vector.load %arg5[%c0_12, %c0_13] : memref<128x1xf32, #tpu.memory_space<vmem>>, vector<128x1xf32>
      tpu.vector_store %arg5[%c0_12, %c0_13], %18 {strides = array<i32>} : memref<128x1xf32, #tpu.memory_space<vmem>>, vector<128x1xf32>,
      %cst_14 = arith.constant 0.000000e+00 : f32
      %20 = vector.broadcast %cst_14 : f32 to vector<128x1xf32>
      %c0_15 = arith.constant 0 : index
      %c0_16 = arith.constant 0 : index
      %21 = vector.load %arg6[%c0_15, %c0_16] : memref<128x1xf32, #tpu.memory_space<vmem>>, vector<128x1xf32>
      tpu.vector_store %arg6[%c0_15, %c0_16], %20 {strides = array<i32>} : memref<128x1xf32, #tpu.memory_space<vmem>>, vector<128x1xf32>,
      %cst_17 = arith.constant 0.000000e+00 : f32
      %22 = vector.broadcast %cst_17 : f32 to vector<128x1xf32>
      %c0_18 = arith.constant 0 : index
      %c0_19 = arith.constant 0 : index
      %23 = vector.load %arg7[%c0_18, %c0_19] : memref<128x1xf32, #tpu.memory_space<vmem>>, vector<128x1xf32>
      tpu.vector_store %arg7[%c0_18, %c0_19], %22 {strides = array<i32>} : memref<128x1xf32, #tpu.memory_space<vmem>>, vector<128x1xf32>,
    } else {
    }
    %c0 = arith.constant 0 : index
    %c0_1 = arith.constant 0 : index
    %3 = vector.load %arg2[%c0, %c0_1] : memref<128x128xbf16, #tpu.memory_space<vmem>>, vector<128x128xbf16>
    %c0_2 = arith.constant 0 : index
    %c0_3 = arith.constant 0 : index
    %4 = vector.load %arg3[%c0_2, %c0_3] : memref<128x128xbf16, #tpu.memory_space<vmem>>, vector<128x128xbf16>
    %cst = arith.constant dense<0.000000e+00> : vector<128x128xf32>
    %5 = tpu.matmul %3, %4, %cst {dimension_numbers = #tpu.dot_dimension_numbers<[1], [1], [0], [0], [0, 0, 1, 0], [], []>} : vector<128x128xbf16>, vector<128x128xbf16>, vector<128x128xf32> -> vector<128x128xf32>
    %6 = arith.cmpi eq, %arg1, %arg0 : i32
    %7 = arith.extui %6 : i1 to i32
    %c0_i32_4 = arith.constant 0 : i32
    %8 = arith.cmpi ne, %7, %c0_i32_4 : i32
    scf.if %8 {
      %18 = tpu.iota {dimensions = array<i32: 0>} : vector<128x128xi32>
      %19 = tpu.iota {dimensions = array<i32: 1>} : vector<128x128xi32>
      %20 = arith.cmpi eq, %18, %19 : vector<128x128xi32>
      %cst_11 = arith.constant 0.000000e+00 : f32
      %21 = vector.broadcast %cst_11 : f32 to vector<128x128xf32>
      %22 = arith.select %20, %5, %21 : vector<128x128xi1>, vector<128x128xf32>
      %cst_12 = arith.constant dense<0.000000e+00> : vector<128xf32>
      %23 = vector.multi_reduction <add>, %22, %cst_12 [1] : vector<128x128xf32> to vector<128xf32>
      %24 = vector.shape_cast %23 : vector<128xf32> to vector<128x1xf32>
      %c0_13 = arith.constant 0 : index
      %c0_14 = arith.constant 0 : index
      %25 = vector.load %arg7[%c0_13, %c0_14] : memref<128x1xf32, #tpu.memory_space<vmem>>, vector<128x1xf32>
      tpu.vector_store %arg7[%c0_13, %c0_14], %24 {strides = array<i32>} : memref<128x1xf32, #tpu.memory_space<vmem>>, vector<128x1xf32>,
    } else {
    }
    %c0_i32_5 = arith.constant 0 : i32
    %9 = arith.cmpi slt, %arg1, %c0_i32_5 : i32
    %10 = arith.extui %9 : i1 to i32
    %c0_i32_6 = arith.constant 0 : i32
    %11 = arith.cmpi ne, %10, %c0_i32_6 : i32
    scf.if %11 {
      %c0_11 = arith.constant 0 : index
      %c0_12 = arith.constant 0 : index
      %18 = vector.load %arg5[%c0_11, %c0_12] : memref<128x1xf32, #tpu.memory_space<vmem>>, vector<128x1xf32>
      %cst_13 = arith.constant dense<0xFF800000> : vector<128xf32>
      %19 = vector.multi_reduction <maximumf>, %5, %cst_13 [1] : vector<128x128xf32> to vector<128xf32>
      %20 = vector.shape_cast %19 : vector<128xf32> to vector<128x1xf32>
      %21 = arith.maximumf %18, %20 : vector<128x1xf32>
      %22 = arith.subf %18, %21 : vector<128x1xf32>
      %23 = math.exp %22 : vector<128x1xf32>
      %c0_14 = arith.constant 0 : index
      %c0_15 = arith.constant 0 : index
      %24 = vector.load %arg6[%c0_14, %c0_15] : memref<128x1xf32, #tpu.memory_space<vmem>>, vector<128x1xf32>
      %25 = arith.mulf %23, %24 : vector<128x1xf32>
      %26 = vector.broadcast %21 : vector<128x1xf32> to vector<128x128xf32>
      %27 = arith.subf %5, %26 : vector<128x128xf32>
      %28 = math.exp %27 : vector<128x128xf32>
      %cst_16 = arith.constant dense<0.000000e+00> : vector<128xf32>
      %29 = vector.multi_reduction <add>, %28, %cst_16 [1] : vector<128x128xf32> to vector<128xf32>
      %30 = vector.shape_cast %29 : vector<128xf32> to vector<128x1xf32>
      %31 = arith.addf %25, %30 : vector<128x1xf32>
      %c0_17 = arith.constant 0 : index
      %c0_18 = arith.constant 0 : index
      %32 = vector.load %arg6[%c0_17, %c0_18] : memref<128x1xf32, #tpu.memory_space<vmem>>, vector<128x1xf32>
      tpu.vector_store %arg6[%c0_17, %c0_18], %31 {strides = array<i32>} : memref<128x1xf32, #tpu.memory_space<vmem>>, vector<128x1xf32>,
      %c0_19 = arith.constant 0 : index
      %c0_20 = arith.constant 0 : index
      %33 = vector.load %arg5[%c0_19, %c0_20] : memref<128x1xf32, #tpu.memory_space<vmem>>, vector<128x1xf32>
      tpu.vector_store %arg5[%c0_19, %c0_20], %21 {strides = array<i32>} : memref<128x1xf32, #tpu.memory_space<vmem>>, vector<128x1xf32>,
    } else {
    }
    %c0_i32_7 = arith.constant 0 : i32
    %12 = arith.cmpi eq, %arg1, %c0_i32_7 : i32
    %13 = arith.extui %12 : i1 to i32
    %c0_i32_8 = arith.constant 0 : i32
    %14 = arith.cmpi ne, %13, %c0_i32_8 : i32
    scf.if %14 {
      %c128_i32 = arith.constant 128 : i32
      %18 = arith.muli %arg1, %c128_i32 : i32
      %19 = tpu.iota {dimensions = array<i32: 1>} : vector<128x128xi32>
      %20 = vector.broadcast %18 : i32 to vector<128x128xi32>
      %21 = arith.addi %20, %19 : vector<128x128xi32>
      %c8_i32 = arith.constant 8 : i32
      %22 = vector.broadcast %c8_i32 : i32 to vector<128x128xi32>
      %23 = arith.cmpi slt, %21, %22 : vector<128x128xi32>
      %cst_11 = arith.constant -1.000000e+30 : f32
      %24 = vector.broadcast %cst_11 : f32 to vector<128x128xf32>
      %25 = arith.select %23, %5, %24 : vector<128x128xi1>, vector<128x128xf32>
      %c0_12 = arith.constant 0 : index
      %c0_13 = arith.constant 0 : index
      %26 = vector.load %arg5[%c0_12, %c0_13] : memref<128x1xf32, #tpu.memory_space<vmem>>, vector<128x1xf32>
      %cst_14 = arith.constant dense<0xFF800000> : vector<128xf32>
      %27 = vector.multi_reduction <maximumf>, %25, %cst_14 [1] : vector<128x128xf32> to vector<128xf32>
      %28 = vector.shape_cast %27 : vector<128xf32> to vector<128x1xf32>
      %29 = arith.maximumf %26, %28 : vector<128x1xf32>
      %30 = arith.subf %26, %29 : vector<128x1xf32>
      %31 = math.exp %30 : vector<128x1xf32>
      %c0_15 = arith.constant 0 : index
      %c0_16 = arith.constant 0 : index
      %32 = vector.load %arg6[%c0_15, %c0_16] : memref<128x1xf32, #tpu.memory_space<vmem>>, vector<128x1xf32>
      %33 = arith.mulf %31, %32 : vector<128x1xf32>
      %34 = vector.broadcast %29 : vector<128x1xf32> to vector<128x128xf32>
      %35 = arith.subf %25, %34 : vector<128x128xf32>
      %36 = math.exp %35 : vector<128x128xf32>
      %cst_17 = arith.constant dense<0.000000e+00> : vector<128xf32>
      %37 = vector.multi_reduction <add>, %36, %cst_17 [1] : vector<128x128xf32> to vector<128xf32>
      %38 = vector.shape_cast %37 : vector<128xf32> to vector<128x1xf32>
      %39 = arith.addf %33, %38 : vector<128x1xf32>
      %c0_18 = arith.constant 0 : index
      %c0_19 = arith.constant 0 : index
      %40 = vector.load %arg6[%c0_18, %c0_19] : memref<128x1xf32, #tpu.memory_space<vmem>>, vector<128x1xf32>
      tpu.vector_store %arg6[%c0_18, %c0_19], %39 {strides = array<i32>} : memref<128x1xf32, #tpu.memory_space<vmem>>, vector<128x1xf32>,
      %c0_20 = arith.constant 0 : index
      %c0_21 = arith.constant 0 : index
      %41 = vector.load %arg5[%c0_20, %c0_21] : memref<128x1xf32, #tpu.memory_space<vmem>>, vector<128x1xf32>
      tpu.vector_store %arg5[%c0_20, %c0_21], %29 {strides = array<i32>} : memref<128x1xf32, #tpu.memory_space<vmem>>, vector<128x1xf32>,
    } else {
    }
    %c0_i32_9 = arith.constant 0 : i32
    %15 = arith.cmpi eq, %arg1, %c0_i32_9 : i32
    %16 = arith.extui %15 : i1 to i32
    %c0_i32_10 = arith.constant 0 : i32
    %17 = arith.cmpi ne, %16, %c0_i32_10 : i32
    scf.if %17 {
      %c0_11 = arith.constant 0 : index
      %c0_12 = arith.constant 0 : index
      %18 = vector.load %arg5[%c0_11, %c0_12] : memref<128x1xf32, #tpu.memory_space<vmem>>, vector<128x1xf32>
      %c0_13 = arith.constant 0 : index
      %c0_14 = arith.constant 0 : index
      %19 = vector.load %arg6[%c0_13, %c0_14] : memref<128x1xf32, #tpu.memory_space<vmem>>, vector<128x1xf32>
      %20 = math.log %19 : vector<128x1xf32>
      %21 = arith.addf %18, %20 : vector<128x1xf32>
      %c0_15 = arith.constant 0 : index
      %c0_16 = arith.constant 0 : index
      %22 = vector.load %arg7[%c0_15, %c0_16] : memref<128x1xf32, #tpu.memory_space<vmem>>, vector<128x1xf32>
      %23 = arith.subf %21, %22 : vector<128x1xf32>
      %c128_i32 = arith.constant 128 : i32
      %24 = arith.muli %arg0, %c128_i32 : i32
      %25 = tpu.iota {dimensions = array<i32: 0>} : vector<128x1xi32>
      %26 = vector.broadcast %24 : i32 to vector<128x1xi32>
      %27 = arith.addi %26, %25 : vector<128x1xi32>
      %c8_i32 = arith.constant 8 : i32
      %28 = vector.broadcast %c8_i32 : i32 to vector<128x1xi32>
      %29 = arith.cmpi slt, %27, %28 : vector<128x1xi32>
      %cst_17 = arith.constant 0.000000e+00 : f32
      %30 = vector.broadcast %cst_17 : f32 to vector<128x1xf32>
      %31 = arith.select %29, %23, %30 : vector<128x1xi1>, vector<128x1xf32>
      %32 = vector.shape_cast %31 : vector<128x1xf32> to vector<1x128x1xf32>
      %cst_18 = arith.constant dense<0.000000e+00> : vector<1xf32>
      %33 = vector.multi_reduction <add>, %32, %cst_18 [1, 2] : vector<1x128x1xf32> to vector<1xf32>
      %34 = vector.shape_cast %33 : vector<1xf32> to vector<1x1x1xf32>
      %35 = vector.extract %34[0, 0, 0] : f32 from vector<1x1x1xf32>
      %36 = vector.broadcast %35 : f32 to vector<1x1x128xf32>
      %c0_19 = arith.constant 0 : index
      %c0_20 = arith.constant 0 : index
      %c0_21 = arith.constant 0 : index
      %37 = vector.load %arg4[%c0_19, %c0_20, %c0_21] : memref<1x1x128xf32, #tpu.memory_space<vmem>>, vector<1x1x128xf32>
      tpu.vector_store %arg4[%c0_19, %c0_20, %c0_21], %36 {strides = array<i32>} : memref<1x1x128xf32, #tpu.memory_space<vmem>>, vector<1x1x128xf32>,
    } else {
    }
    return
  }
  func.func @transform_0(%arg0: i32, %arg1: i32) -> (i32, i32) {
    %c0_i32 = arith.constant 0 : i32
    %c0_i32_0 = arith.constant 0 : i32
    return %arg0, %c0_i32 : i32, i32
  }
  func.func @transform_1(%arg0: i32, %arg1: i32) -> (i32, i32) {
    %c0_i32 = arith.constant 0 : i32
    %c0_i32_0 = arith.constant 0 : i32
    return %arg1, %c0_i32 : i32, i32
  }
  func.func @transform_2(%arg0: i32, %arg1: i32) -> (i32, i32, i32) {
    %c0_i32 = arith.constant 0 : i32
    %c0_i32_0 = arith.constant 0 : i32
    %c0_i32_1 = arith.constant 0 : i32
    return %arg0, %c0_i32, %c0_i32_0 : i32, i32, i32
  }
}

</mosaic_0001>

<bundles_post_ra>
// kernel: tpu_custom_call.1
= control target key start
LH: loop header
LB: loop body
LE: loop exit
PB: predicated region body
PF: predicated region fallthrough
CT: control target
= control target key end

     0   :  { %7 = vsyncpa [#allocation6], 0  ;;  %s2131_s0 = inlined_call_operand.hbm [shape: bf16[128,128], index: 0, kind: input, shape index: {}]   ;;  %s2132_s1 = inlined_call_operand.hbm [shape: bf16[128,128], index: 1, kind: input, shape index: {}]   ;;  %s2133_s2 = inlined_call_operand.hbm [shape: f32[1,1,128], index: 2, kind: output, shape index: {}]  }
   0x1   :  { %8 = vsyncpa [#allocation9], 0 }
   0x2   :  { %9 = vsyncpa [#allocation7], 0  ;;  %s1641_s9 = smov [#allocation5]   ;;  %s1569_s13 = scalar_lea.hbm %s2131_s0, 1024 }
   0x3   :  { %s15_s10 = sshll.u32 %s1641_s9, 4  ;;  %p1570_p0 = scmp.ne.s32.totalorder %s2131_s0, %s1569_s13  ;;  %s16_s10 = int_to_ptr.vmem [resolvable:$true] %s15_s10 }
   0x4   :  { %p1573_p1 = scmp.lt.u32.totalorder %s1569_s13, %s2131_s0 }
   0x6   :  { %p1575_p2 = pnand %p1573_p1, %p1570_p0 }
   0x8   :  { %1578 = shalt.err (!%p1575_p2)
}
   0x9   :  { %s1579_s18 = scalar_lea.vmem %s16_s10, 1024  ;;  %p1584_p4 = scmp.lt.s32.totalorder %s16_s10, %s16_s10 }
   0xa   :  { %p1580_p3 = scmp.ne.s32.totalorder %s16_s10, %s1579_s18  ;;  %p1585_p5 = scmp.lt.s32.totalorder %s1579_s18, %s1579_s18 }
   0xc   :  { %p1586_p6 = por %p1585_p5, %p1584_p4 }
   0xe   :  { %p1587_p7 = pnand %p1586_p6, %p1580_p3 }
  0x10   :  { %1590 = shalt.err (!%p1587_p7)
}
  0x11   :  { %s1642_s19 = smov 64   ;;  %s1643_s20 = smov 4  }
  0x12   :  { %21 = dma.hbm_to_vmem [thread:$0]  %s2131_s0, 1024, %s16_s10, [#allocation6], %s1642_s19, %s1642_s19, %s1643_s20  }
  0x13   :  { %s1644_s23 = smov [#allocation8]   ;;  %s1591_s27 = scalar_lea.hbm %s2132_s1, 1024 }
  0x14   :  { %s27_s24 = sshll.u32 %s1644_s23, 4  ;;  %p1592_p8 = scmp.ne.s32.totalorder %s2132_s1, %s1591_s27  ;;  %s28_s24 = int_to_ptr.vmem [resolvable:$true] %s27_s24 }
  0x15   :  { %p1595_p9 = scmp.lt.u32.totalorder %s1591_s27, %s2132_s1 }
  0x17   :  { %p1597_p10 = pnand %p1595_p9, %p1592_p8 }
  0x19   :  { %1600 = shalt.err (!%p1597_p10)
}
  0x1a   :  { %s1601_s4 = scalar_lea.vmem %s28_s24, 1024  ;;  %p1606_p12 = scmp.lt.s32.totalorder %s28_s24, %s28_s24 }
  0x1b   :  { %p1602_p11 = scmp.ne.s32.totalorder %s28_s24, %s1601_s4  ;;  %p1607_p13 = scmp.lt.s32.totalorder %s1601_s4, %s1601_s4 }
  0x1d   :  { %p1608_p0 = por %p1607_p13, %p1606_p12 }
  0x1f   :  { %p1609_p1 = pnand %p1608_p0, %p1602_p11 }
  0x21   :  { %1612 = shalt.err (!%p1609_p1)
}
  0x22   :  { %33 = dma.hbm_to_vmem [thread:$0]  %s2132_s1, 1024, %s28_s24, [#allocation9], %s1642_s19, %s1642_s19, %s1643_s20  }
  0x23   :  { %1635 = dma.done.wait [#allocation6], 1024  }
  0x24   :  { %1636 = vsyncadd [#allocation6], 4294966272 }
  0x25   :  { %1637 = dma.done.wait [#allocation9], 1024  }
  0x26   :  { %1638 = vsyncadd [#allocation9], 4294966272  ;;  %v1487_v0 = vld [vmem:[#allocation8] sm:$0xff]   ;;  %v1488_v1 = vld [vmem:[#allocation8 + $0x8] sm:$0xff]   ;;  %vm45_vm0 = vcmask 7168   ;;  %v323_v17 = vlaneseq  ;;  %v1646_v37 = vmov 0  }
  0x27   :  { %1427 = vmatprep.subr.bf16.mxu0 %v1487_v0  ;;  %1459 = vmatprep.subr.bf16.mxu1 %v1487_v0  ;;  %v1489_v2 = vld [vmem:[#allocation8 + $0x10] sm:$0xff]   ;;  %v1495_v3 = vld [vmem:[#allocation5] sm:$0xff]   ;;  %v1490_v5 = vld [vmem:[#allocation8 + $0x18] sm:$0xff]   ;;  %v1645_v16 = vmov -1e+30   ;;  %v1647_v40 = vmov 0.0  }
  0x28   :  { %1428 = vmatpush3.bf16.xpose.msra.mxu0 %v1487_v0  ;;  %1467 = vmatpush3.bf16.xpose.msra.mxu1 %v1487_v0  ;;  %v1499_v4 = vld [vmem:[#allocation5 + $0x20] sm:$0xff]   ;;  %v1492_v7 = vld [vmem:[#allocation8 + $0x28] sm:$0xff]   ;;  %v1493_v8 = vld [vmem:[#allocation8 + $0x30] sm:$0xff]   ;;  %46 = vst.msk [vmem:[#allocation2] sm:$0xff] %vm45_vm0, %v1645_v16  ;;  %v1705_v18 = vand.u32 127, %v323_v17  ;;  %s1648_s1 = smov [#allocation10]  }
  0x29   :  { %1429 = vmatprep.subr.bf16.mxu0 %v1488_v1  ;;  %1460 = vmatprep.subr.bf16.mxu1 %v1488_v1  ;;  %v1491_v6 = vld [vmem:[#allocation8 + $0x20] sm:$0xff]   ;;  %v1494_v9 = vld [vmem:[#allocation8 + $0x38] sm:$0xff]   ;;  %v1496_v10 = vld [vmem:[#allocation5 + $0x8] sm:$0xff]   ;;  %47 = vst.msk [vmem:[#allocation2 + $0x8] sm:$0xff] %vm45_vm0, %v1645_v16  ;;  %s1385_s6 = sshll.u32 %s1648_s1, 4  ;;  %s1386_s6 = int_to_ptr.vmem [resolvable:$true] %s1385_s6 }
  0x2a   :  { %1443 = vmatprep.mubr.bf16.mxu0 %v1495_v3  ;;  %1451 = vmatprep.mubr.bf16.mxu1 %v1499_v4  ;;  %v1500_v11 = vld [vmem:[#allocation5 + $0x28] sm:$0xff]   ;;  %v1497_v12 = vld [vmem:[#allocation5 + $0x10] sm:$0xff]   ;;  %v1498_v14 = vld [vmem:[#allocation5 + $0x18] sm:$0xff]   ;;  %48 = vst.msk [vmem:[#allocation2 + $0x10] sm:$0xff] %vm45_vm0, %v1645_v16  ;;  %vm788_vm1 = vcmp.lt.s32.totalorder %v1705_v18, 8  ;;  %s1613_s8 = scalar_lea.vmem %s1386_s6, 16  ;;  %p1618_p3 = scmp.lt.s32.totalorder %s1386_s6, %s1386_s6 }
  0x2b   :  { %v1501_v13 = vld [vmem:[#allocation5 + $0x30] sm:$0xff]   ;;  %v1502_v15 = vld [vmem:[#allocation5 + $0x38] sm:$0xff]   ;;  %49 = vst.msk [vmem:[#allocation2 + $0x18] sm:$0xff] %vm45_vm0, %v1645_v16  ;;  %50 = vst.msk [vmem:[#allocation2 + $0x20] sm:$0xff] %vm45_vm0, %v1645_v16  ;;  %1485 = vset.pattern.permute.xlu0 %v1646_v37  ;;  %1486 = vset.pattern.permute.xlu1 %v1646_v37  ;;  %p1614_p2 = scmp.ne.s32.totalorder %s1386_s6, %s1613_s8  ;;  %s1617_s9 = scalar_lea.vmem %s1386_s6, 32 }
  0x2c   :  { %51 = vst.msk [vmem:[#allocation2 + $0x28] sm:$0xff] %vm45_vm0, %v1645_v16  ;;  %52 = vst.msk [vmem:[#allocation2 + $0x30] sm:$0xff] %vm45_vm0, %v1645_v16  ;;  %p1619_p4 = scmp.lt.s32.totalorder %s1617_s9, %s1613_s8 }
  0x2d   :  { %53 = vst.msk [vmem:[#allocation2 + $0x38] sm:$0xff] %vm45_vm0, %v1645_v16  ;;  %54 = vst.msk [vmem:[#allocation2 + $0x40] sm:$0xff] %vm45_vm0, %v1645_v16 }
  0x2e   :  { %55 = vst.msk [vmem:[#allocation2 + $0x48] sm:$0xff] %vm45_vm0, %v1645_v16  ;;  %56 = vst.msk [vmem:[#allocation2 + $0x50] sm:$0xff] %vm45_vm0, %v1645_v16  ;;  %p1620_p5 = por %p1619_p4, %p1618_p3 }
  0x2f   :  { %57 = vst.msk [vmem:[#allocation2 + $0x58] sm:$0xff] %vm45_vm0, %v1645_v16  ;;  %58 = vst.msk [vmem:[#allocation2 + $0x60] sm:$0xff] %vm45_vm0, %v1645_v16  ;;  %v1835_v50 = vld [vmem:[#allocation2] sm:$0xff] }
  0x30   :  { %1430 = vmatpush3.bf16.xpose.msra.mxu0 %v1488_v1  ;;  %1468 = vmatpush3.bf16.xpose.msra.mxu1 %v1488_v1  ;;  %59 = vst.msk [vmem:[#allocation2 + $0x68] sm:$0xff] %vm45_vm0, %v1645_v16  ;;  %60 = vst.msk [vmem:[#allocation2 + $0x70] sm:$0xff] %vm45_vm0, %v1645_v16  ;;  %v1837_v52 = vld [vmem:[#allocation2 + $0x8] sm:$0xff]  ;;  %p1621_p6 = pnand %p1620_p5, %p1614_p2 }
  0x31   :  { %1431 = vmatprep.subr.bf16.mxu0 %v1489_v2  ;;  %1461 = vmatprep.subr.bf16.mxu1 %v1489_v2  ;;  %61 = vst.msk [vmem:[#allocation2 + $0x78] sm:$0xff] %vm45_vm0, %v1645_v16  ;;  %62 = vst.msk [vmem:[#allocation3] sm:$0xff] %vm45_vm0, %v1647_v40  ;;  %v1850_v57 = vld [vmem:[#allocation2 + $0x10] sm:$0xff] }
  0x32   :  { %63 = vst.msk [vmem:[#allocation3 + $0x8] sm:$0xff] %vm45_vm0, %v1647_v40  ;;  %64 = vst.msk [vmem:[#allocation3 + $0x10] sm:$0xff] %vm45_vm0, %v1647_v40  ;;  %v1857_v60 = vld [vmem:[#allocation2 + $0x18] sm:$0xff]  ;;  %v1866_v0 = vld [vmem:[#allocation2 + $0x20] sm:$0xff] }
  0x33   :  { %65 = vst.msk [vmem:[#allocation3 + $0x18] sm:$0xff] %vm45_vm0, %v1647_v40  ;;  %66 = vst.msk [vmem:[#allocation3 + $0x20] sm:$0xff] %vm45_vm0, %v1647_v40  ;;  %v1873_v3 = vld [vmem:[#allocation2 + $0x28] sm:$0xff] }
  0x34   :  { %67 = vst.msk [vmem:[#allocation3 + $0x28] sm:$0xff] %vm45_vm0, %v1647_v40  ;;  %68 = vst.msk [vmem:[#allocation3 + $0x30] sm:$0xff] %vm45_vm0, %v1647_v40 }
  0x35   :  { %69 = vst.msk [vmem:[#allocation3 + $0x38] sm:$0xff] %vm45_vm0, %v1647_v40  ;;  %70 = vst.msk [vmem:[#allocation3 + $0x40] sm:$0xff] %vm45_vm0, %v1647_v40  ;;  %v1906_v16 = vld [vmem:[#allocation2 + $0x48] sm:$0xff] }
  0x36   :  { %71 = vst.msk [vmem:[#allocation3 + $0x48] sm:$0xff] %vm45_vm0, %v1647_v40  ;;  %72 = vst.msk [vmem:[#allocation3 + $0x50] sm:$0xff] %vm45_vm0, %v1647_v40 }
  0x37   :  { %73 = vst.msk [vmem:[#allocation3 + $0x58] sm:$0xff] %vm45_vm0, %v1647_v40  ;;  %74 = vst.msk [vmem:[#allocation3 + $0x60] sm:$0xff] %vm45_vm0, %v1647_v40 }
  0x38   :  { %1432 = vmatpush3.bf16.xpose.msra.mxu0 %v1489_v2  ;;  %1469 = vmatpush3.bf16.xpose.msra.mxu1 %v1489_v2  ;;  %75 = vst.msk [vmem:[#allocation3 + $0x68] sm:$0xff] %vm45_vm0, %v1647_v40  ;;  %76 = vst.msk [vmem:[#allocation3 + $0x70] sm:$0xff] %vm45_vm0, %v1647_v40 }
  0x39   :  { %1433 = vmatprep.subr.bf16.mxu0 %v1490_v5  ;;  %1462 = vmatprep.subr.bf16.mxu1 %v1490_v5  ;;  %77 = vst.msk [vmem:[#allocation3 + $0x78] sm:$0xff] %vm45_vm0, %v1647_v40  ;;  %78 = vst.msk [vmem:[#allocation4] sm:$0xff] %vm45_vm0, %v1647_v40 }
  0x3a   :  { %2155 = vst [vmem:[#allocation18_spill] sm:$0xff] %v1906_v16 }
  0x40   :  { %1434 = vmatpush3.bf16.xpose.msra.mxu0 %v1490_v5  ;;  %1470 = vmatpush3.bf16.xpose.msra.mxu1 %v1490_v5 }
  0x41   :  { %1435 = vmatprep.subr.bf16.mxu0 %v1491_v6  ;;  %1463 = vmatprep.subr.bf16.mxu1 %v1491_v6 }
  0x48   :  { %1436 = vmatpush3.bf16.xpose.msra.mxu0 %v1491_v6  ;;  %1471 = vmatpush3.bf16.xpose.msra.mxu1 %v1491_v6  ;;  %v1880_v6 = vld [vmem:[#allocation2 + $0x30] sm:$0xff] }
  0x49   :  { %1437 = vmatprep.subr.bf16.mxu0 %v1492_v7  ;;  %1464 = vmatprep.subr.bf16.mxu1 %v1492_v7 }
  0x50   :  { %1438 = vmatpush3.bf16.xpose.msra.mxu0 %v1492_v7  ;;  %1472 = vmatpush3.bf16.xpose.msra.mxu1 %v1492_v7 }
  0x51   :  { %1439 = vmatprep.subr.bf16.mxu0 %v1493_v8  ;;  %1465 = vmatprep.subr.bf16.mxu1 %v1493_v8 }
  0x58   :  { %1440 = vmatpush3.bf16.xpose.msra.mxu0 %v1493_v8  ;;  %1473 = vmatpush3.bf16.xpose.msra.mxu1 %v1493_v8 }
  0x59   :  { %1441 = vmatprep.subr.bf16.mxu0 %v1494_v9  ;;  %1466 = vmatprep.subr.bf16.mxu1 %v1494_v9 }
  0x60   :  { %1442 = vmatpush3.bf16.xpose.msra.mxu0 %v1494_v9  ;;  %1474 = vmatpush3.bf16.xpose.msra.mxu1 %v1494_v9  ;;  %v1887_v9 = vld [vmem:[#allocation2 + $0x38] sm:$0xff] }
  0x67   :  { %1444 = vmatmul.mubr.bf16.vlgmr.msra.gmra.mrb[0].mxu0 %v1496_v10  ;;  %1452 = vmatmul.mubr.bf16.vlgmr.msra.gmra.mrb[0].mxu1 %v1500_v11 }
  0x68   :  { %1447 = vmatprep.mubr.bf16.mxu0 %v1497_v12  ;;  %1455 = vmatprep.mubr.bf16.mxu1 %v1501_v13  ;;  %v1894_v12 = vld [vmem:[#allocation2 + $0x40] sm:$0xff] }
  0x69   :  { %2153 = vst [vmem:[#allocation16_spill] sm:$0xff] %v1894_v12 }
  0x6f   :  { %1448 = vmatmul.mubr.bf16.gmra.mrb[4].mxu0 %v1498_v14  ;;  %1456 = vmatmul.mubr.bf16.gmra.mrb[4].mxu1 %v1502_v15 }
 0x13a   :  { %v1708_v19 = vpop.f32.mrb[0].mxu0  ;;  %v1710_v20 = vpop.f32.mrb[0].mxu1 }
 0x13b   :  { %v1712_v21 = vpop.f32.mrb[1].mxu0  ;;  %v1714_v22 = vpop.f32.mrb[1].mxu1  ;;  %v1739_v29 = vsel %vm788_vm1, %v1708_v19, -1e+30  ;;  %v1816_v45 = vsel %vm788_vm1, %v1710_v20, -1e+30 }
 0x13c   :  { %v1716_v23 = vpop.f32.mrb[2].mxu0  ;;  %v1721_v24 = vsel %vm788_vm1, %v1712_v21, -1e+30  ;;  %v1723_v25 = vpop.f32.mrb[2].mxu1  ;;  %v1800_v41 = vsel %vm788_vm1, %v1714_v22, -1e+30 }
 0x13d   :  { %821 = vmax.xlane.f32.xlu0 %v1721_v24  ;;  %v1726_v26 = vpop.f32.mrb[3].mxu0  ;;  %v1728_v27 = vpop.f32.mrb[3].mxu1  ;;  %v1753_v34 = vsel %vm788_vm1, %v1716_v23, -1e+30  ;;  %v1822_v46 = vsel %vm788_vm1, %v1723_v25, -1e+30 }
 0x13e   :  { %v1733_v28 = vsel %vm788_vm1, %v1726_v26, -1e+30  ;;  %v1808_v43 = vsel %vm788_vm1, %v1728_v27, -1e+30 }
 0x13f   :  { %823 = vmax.xlane.f32.xlu1 %v1733_v28 }
 0x142   :  { %v1741_v30 = vpop.f32.mrb[4].mxu0  ;;  %v1803_v42 = vpop.f32.mrb[4].mxu1 }
 0x143   :  { %825 = vmax.xlane.f32.xlu1 %v1739_v29  ;;  %v1744_v31 = vpop.f32.mrb[5].mxu0  ;;  %v1771_v38 = vsel %vm788_vm1, %v1741_v30, -1e+30  ;;  %2151 = vst [vmem:[#allocation14_spill] sm:$0xff] %v1803_v42  ;;  %v1810_v44 = vpop.f32.mrb[5].mxu1 }
 0x144   :  { %v1746_v32 = vpop.f32.mrb[6].mxu0  ;;  %v1759_v35 = vsel %vm788_vm1, %v1744_v31, -1e+30  ;;  %v1825_v47 = vpop.f32.mrb[6].mxu1  ;;  %v1901_v14 = vsel %vm788_vm1, %v1810_v44, -1e+30 }
 0x145   :  { %v1748_v33 = vpop.f32.mrb[7].mxu0  ;;  %v1777_v39 = vsel %vm788_vm1, %v1746_v32, -1e+30  ;;  %2152 = vst [vmem:[#allocation15_spill] sm:$0xff] %v1825_v47  ;;  %v1827_v48 = vpop.f32.mrb[7].mxu1 }
 0x146   :  { %v1765_v36 = vsel %vm788_vm1, %v1748_v33, -1e+30  ;;  %v1832_v49 = vsel %vm788_vm1, %v1827_v48, -1e+30 }
 0x147   :  { %827 = vmax.xlane.f32.xlu1 %v1753_v34 }
 0x14b   :  { %829 = vmax.xlane.f32.xlu1 %v1759_v35 }
 0x14f   :  { %831 = vmax.xlane.f32.xlu1 %v1765_v36 }
 0x153   :  { %833 = vmax.xlane.f32.xlu1 %v1771_v38 }
 0x157   :  { %835 = vmax.xlane.f32.xlu1 %v1777_v39 }
 0x15b   :  { %837 = vmax.xlane.f32.xlu1 %v1800_v41 }
 0x15f   :  { %839 = vmax.xlane.f32.xlu1 %v1808_v43 }
 0x163   :  { %841 = vmax.xlane.f32.xlu1 %v1816_v45 }
 0x167   :  { %843 = vmax.xlane.f32.xlu1 %v1822_v46 }
 0x16b   :  { %847 = vmax.xlane.f32.xlu1 %v1832_v49 }
 0x1ca   :  { %v822_v51 = vpop.xlane.xlu0 %821 }
 0x1cb   :  { %v1840_v53 = vmax.f32 %v1835_v50, %v822_v51 }
 0x1cc   :  { %v824_v54 = vpop.xlane.xlu1 %823 }
 0x1cd   :  { %1142 = vst.msk [vmem:[#allocation2] sm:$0xff] %vm45_vm0, %v1840_v53  ;;  %v1847_v56 = vmax.f32 %v1837_v52, %v824_v54  ;;  %951 = vperm.xlu0 %1485, %v1840_v53   ;;  %v1916_v54 = vld [vmem:[#allocation2 + $0x50] sm:$0xff] }
 0x1ce   :  { %2156 = vst [vmem:[#allocation19_spill] sm:$0xff] %v1916_v54 }
 0x1cf   :  { %1143 = vst.msk [vmem:[#allocation2 + $0x8] sm:$0xff] %vm45_vm0, %v1847_v56 }
 0x1d0   :  { %v826_v58 = vpop.xlane.xlu1 %825 }
 0x1d1   :  { %v1855_v59 = vmax.f32 %v1850_v57, %v826_v58 }
 0x1d3   :  { %1144 = vst.msk [vmem:[#allocation2 + $0x10] sm:$0xff] %vm45_vm0, %v1855_v59 }
 0x1d4   :  { %v828_v62 = vpop.xlane.xlu1 %827 }
 0x1d5   :  { %v1864_v63 = vmax.f32 %v1857_v60, %v828_v62 }
 0x1d7   :  { %1145 = vst.msk [vmem:[#allocation2 + $0x18] sm:$0xff] %vm45_vm0, %v1864_v63 }
 0x1d8   :  { %v830_v1 = vpop.xlane.xlu1 %829 }
 0x1d9   :  { %v1871_v2 = vmax.f32 %v1866_v0, %v830_v1 }
 0x1db   :  { %1146 = vst.msk [vmem:[#allocation2 + $0x20] sm:$0xff] %vm45_vm0, %v1871_v2 }
 0x1dc   :  { %v832_v4 = vpop.xlane.xlu1 %831 }
 0x1dd   :  { %v1878_v5 = vmax.f32 %v1873_v3, %v832_v4 }
 0x1df   :  { %1147 = vst.msk [vmem:[#allocation2 + $0x28] sm:$0xff] %vm45_vm0, %v1878_v5 }
 0x1e0   :  { %v834_v7 = vpop.xlane.xlu1 %833 }
 0x1e1   :  { %v1885_v8 = vmax.f32 %v1880_v6, %v834_v7  ;;  %v1930_v7 = vld [vmem:[#allocation2 + $0x58] sm:$0xff] }
 0x1e2   :  { %2158 = vst [vmem:[#allocation21_spill] sm:$0xff] %v1930_v7 }
 0x1e3   :  { %1148 = vst.msk [vmem:[#allocation2 + $0x30] sm:$0xff] %vm45_vm0, %v1885_v8 }
 0x1e4   :  { %v836_v10 = vpop.xlane.xlu1 %835 }
 0x1e5   :  { %v1892_v11 = vmax.f32 %v1887_v9, %v836_v10 }
 0x1e7   :  { %1149 = vst.msk [vmem:[#allocation2 + $0x38] sm:$0xff] %vm45_vm0, %v1892_v11 }
 0x1e8   :  { %v838_v13 = vpop.xlane.xlu1 %837 }
 0x1e9   :  { %v1904_v15 = vmax.f32 %v1894_v12, %v838_v13  ;;  %v1937_v13 = vld [vmem:[#allocation2 + $0x68] sm:$0xff]  ;;  %v1991_v12 = vld [vmem:[#allocation2 + $0x78] sm:$0xff] }
 0x1ea   :  { %2160 = vst [vmem:[#allocation23_spill] sm:$0xff] %v1937_v13  ;;  %2167 = vst [vmem:[#allocation29_spill] sm:$0xff] %v1991_v12 }
 0x1eb   :  { %2154 = vst [vmem:[#allocation17_spill] sm:$0xff] %v1904_v15  ;;  %1150 = vst.msk [vmem:[#allocation2 + $0x40] sm:$0xff] %vm45_vm0, %v1904_v15 }
 0x1ec   :  { %845 = vmax.xlane.f32.xlu0 %v1901_v14  ;;  %v840_v40 = vpop.xlane.xlu1 %839 }
 0x1ed   :  { %v1914_v51 = vmax.f32 %v1906_v16, %v840_v40 }
 0x1ef   :  { %1151 = vst.msk [vmem:[#allocation2 + $0x48] sm:$0xff] %vm45_vm0, %v1914_v51 }
 0x1f0   :  { %v842_v58 = vpop.xlane.xlu1 %841 }
 0x1f1   :  { %v1921_v62 = vmax.f32 %v1916_v54, %v842_v58  ;;  %v1985_v54 = vld [vmem:[#allocation2 + $0x70] sm:$0xff] }
 0x1f2   :  { %2165 = vst [vmem:[#allocation27_spill] sm:$0xff] %v1985_v54 }
 0x1f3   :  { %2157 = vst [vmem:[#allocation20_spill] sm:$0xff] %v1921_v62  ;;  %1152 = vst.msk [vmem:[#allocation2 + $0x50] sm:$0xff] %vm45_vm0, %v1921_v62 }
 0x1f4   :  { %v844_v4 = vpop.xlane.xlu1 %843 }
 0x1f5   :  { %v1933_v10 = vmax.f32 %v1930_v7, %v844_v4  ;;  %v1948_v4 = vsel %vm788_vm1, %v1803_v42, -1e+30  ;;  %v1158_v42 = vld [vmem:[#allocation2] sm:$0xff] }
 0x1f7   :  { %2159 = vst [vmem:[#allocation22_spill] sm:$0xff] %v1933_v10  ;;  %1153 = vst.msk [vmem:[#allocation2 + $0x58] sm:$0xff] %vm45_vm0, %v1933_v10 }
 0x1f8   :  { %v848_v40 = vpop.xlane.xlu1 %847 }
 0x1f9   :  { %v1940_v58 = vmax.f32 %v1937_v13, %v848_v40  ;;  %v1952_v40 = vshrl.u32 %v323_v17, 7 }
 0x1fb   :  { %2161 = vst [vmem:[#allocation24_spill] sm:$0xff] %v1940_v58  ;;  %1155 = vst.msk [vmem:[#allocation2 + $0x68] sm:$0xff] %vm45_vm0, %v1940_v58  ;;  %vm342_vm2 = vcmp.eq.s32.totalorder %v1952_v40, %v1705_v18 }
 0x202   :  { %961 = vperm.xlu0 %1485, %v1855_v59  }
 0x206   :  { %991 = vperm.xlu0 %1485, %v1904_v15  }
 0x20a   :  { %1001 = vperm.xlu0 %1485, %v1921_v62   ;;  %v1957_v62 = vsel %vm788_vm1, %v1825_v47, -1e+30 }
 0x24c   :  { %v952_v1 = vpop.permute.xlu0 %951 }
 0x24d   :  { %v1029_v37 = vsub.f32 %v1721_v24, %v952_v1  ;;  %v358_v24 = vsel %vm342_vm2, %v1712_v21, 0.0  ;;  %v2164_v21 = vsub.f32 %v1835_v50, %v1840_v53 }
 0x24f   :  { %v1045_v61 = vmul.f32 1.442695, %v1029_v37  ;;  %v885_v1 = vmul.f32 1.442695, %v2164_v21 }
 0x251   :  { %1503 = vpow2.f32 %v1045_v61 }
 0x252   :  { %1505 = vpow2.f32 %v885_v1 }
 0x25b   :  { %v1504_v55 = vpop.eup %1503 }
 0x25c   :  { %1077 = vadd.xlane.f32.xlu1 %v1504_v55  ;;  %v1963_v55 = vld [vmem:[#allocation2 + $0x60] sm:$0xff] }
 0x25d   :  { %2162 = vst [vmem:[#allocation25_spill] sm:$0xff] %v1963_v55 }
 0x260   :  { %849 = vmax.xlane.f32.xlu1 %v1948_v4 }
 0x264   :  { %851 = vmax.xlane.f32.xlu1 %v1957_v62 }
 0x268   :  { %374 = vadd.xlane.f32.xlu1 %v358_v24  ;;  %v1506_v24 = vpop.eup %1505 }
 0x279   :  { %956 = vperm.xlu1 %1486, %v1847_v56   ;;  %v846_v61 = vpop.xlane.xlu0 %845 }
 0x27a   :  { %v1967_v17 = vmax.f32 %v1963_v55, %v846_v61  ;;  %v917_v61 = vld [vmem:[#allocation3] sm:$0xff] }
 0x27b   :  { %v933_v37 = vmul.f32 %v1506_v24, %v917_v61 }
 0x27c   :  { %2163 = vst [vmem:[#allocation26_spill] sm:$0xff] %v1967_v17  ;;  %1154 = vst.msk [vmem:[#allocation2 + $0x60] sm:$0xff] %vm45_vm0, %v1967_v17  ;;  %1011 = vperm.xlu0 %1485, %v1967_v17  }
 0x27d   :  { %966 = vperm.xlu1 %1486, %v1864_v63  }
 0x281   :  { %971 = vperm.xlu1 %1486, %v1871_v2   ;;  %v962_v1 = vpop.permute.xlu0 %961 }
 0x285   :  { %976 = vperm.xlu1 %1486, %v1878_v5  }
 0x289   :  { %981 = vperm.xlu1 %1486, %v1885_v8  }
 0x28d   :  { %986 = vperm.xlu1 %1486, %v1892_v11  }
 0x291   :  { %996 = vperm.xlu1 %1486, %v1914_v51  }
 0x295   :  { %1006 = vperm.xlu1 %1486, %v1933_v10  }
 0x299   :  { %1016 = vperm.xlu1 %1486, %v1940_v58  }
 0x2e9   :  { %v1078_v17 = vpop.xlane.xlu1 %1077 }
 0x2ea   :  { %v1109_v55 = vadd.f32 %v1078_v17, %v933_v37 }
 0x2ec   :  { %1126 = vst.msk [vmem:[#allocation3] sm:$0xff] %vm45_vm0, %v1109_v55 }
 0x2ed   :  { %v850_v13 = vpop.xlane.xlu1 %849 }
 0x2ee   :  { %v1989_v15 = vmax.f32 %v1985_v54, %v850_v13 }
 0x2f0   :  { %2166 = vst [vmem:[#allocation28_spill] sm:$0xff] %v1989_v15  ;;  %1156 = vst.msk [vmem:[#allocation2 + $0x70] sm:$0xff] %vm45_vm0, %v1989_v15  ;;  %1021 = vperm.xlu0 %1485, %v1989_v15  }
 0x2f1   :  { %v852_v53 = vpop.xlane.xlu1 %851 }
 0x2f2   :  { %v1999_v17 = vmax.f32 %v1991_v12, %v852_v53  ;;  %v1031_v53 = vsub.f32 %v1739_v29, %v962_v1  ;;  %v992_v1 = vpop.permute.xlu0 %991 }
 0x2f3   :  { %v1174_v37 = vld [vmem:[#allocation3] sm:$0xff] }
 0x2f4   :  { %2168 = vst [vmem:[#allocation30_spill] sm:$0xff] %v1999_v17  ;;  %1157 = vst.msk [vmem:[#allocation2 + $0x78] sm:$0xff] %vm45_vm0, %v1999_v17  ;;  %1026 = vperm.xlu1 %1486, %v1999_v17   ;;  %1507 = vlog2.f32 %v1174_v37  ;;  %v1049_v54 = vmul.f32 1.442695, %v1031_v53 }
 0x2f5   :  { %v375_v13 = vpop.xlane.xlu1 %374 }
 0x2f6   :  { %407 = vst.msk [vmem:[#allocation4] sm:$0xff] %vm45_vm0, %v375_v13  ;;  %1509 = vpow2.f32 %v1049_v54 }
 0x2f9   :  { %v957_v21 = vpop.permute.xlu1 %956 }
 0x2fa   :  { %v1030_v12 = vsub.f32 %v1733_v28, %v957_v21 }
 0x2fc   :  { %v1047_v7 = vmul.f32 1.442695, %v1030_v12 }
 0x2fd   :  { %v967_v24 = vpop.permute.xlu1 %966  ;;  %v1238_v16 = vld [vmem:[#allocation4] sm:$0xff] }
 0x2fe   :  { %v1508_v61 = vpop.eup %1507  ;;  %v1032_v55 = vsub.f32 %v1753_v34, %v967_v24 }
 0x2ff   :  { %v1191_v15 = vmul.f32 0.6931472, %v1508_v61 }
 0x300   :  { %v1051_v37 = vmul.f32 1.442695, %v1032_v55  ;;  %v1510_v54 = vpop.eup %1509 }
 0x301   :  { %v972_v50 = vpop.permute.xlu1 %971  ;;  %v1222_v17 = vadd.f32 %v1191_v15, %v1158_v42 }
 0x302   :  { %v1033_v10 = vsub.f32 %v1759_v35, %v972_v50  ;;  %1511 = vpow2.f32 %v1051_v37  ;;  %v1037_v35 = vsub.f32 %v1800_v41, %v992_v1 }
 0x303   :  { %v1254_v29 = vsub.f32 %v1222_v17, %v1238_v16  ;;  %1513 = vpow2.f32 %v1047_v7 }
 0x304   :  { %v1053_v34 = vmul.f32 1.442695, %v1033_v10 }
 0x305   :  { %v977_v58 = vpop.permute.xlu1 %976  ;;  %v1337_v15 = vsel %vm45_vm0, %v1254_v29, 0.0 }
 0x306   :  { %v1034_v13 = vsub.f32 %v1765_v36, %v977_v58  ;;  %v1002_v58 = vpop.permute.xlu0 %1001 }
 0x308   :  { %v1055_v61 = vmul.f32 1.442695, %v1034_v13 }
 0x309   :  { %v982_v47 = vpop.permute.xlu1 %981 }
 0x30a   :  { %v1035_v28 = vsub.f32 %v1771_v38, %v982_v47  ;;  %1515 = vpow2.f32 %v1055_v61  ;;  %v1061_v47 = vmul.f32 1.442695, %v1037_v35  ;;  %v1012_v17 = vpop.permute.xlu0 %1011 }
 0x30b   :  { %1517 = vpow2.f32 %v1053_v34 }
 0x30c   :  { %v1057_v12 = vmul.f32 1.442695, %v1035_v28  ;;  %v1512_v50 = vpop.eup %1511 }
 0x30d   :  { %v987_v21 = vpop.permute.xlu1 %986  ;;  %v1514_v41 = vpop.eup %1513 }
 0x30e   :  { %v1036_v42 = vsub.f32 %v1777_v39, %v987_v21  ;;  %v1039_v39 = vsub.f32 %v1816_v45, %v1002_v58 }
 0x30f   :  { %1368 = vadd.xlane.f32.xlu0 %v1337_v15 }
 0x310   :  { %v1059_v36 = vmul.f32 1.442695, %v1036_v42  ;;  %v1065_v53 = vmul.f32 1.442695, %v1039_v39  ;;  %v326_v39 = vadd.s32 16, %v1952_v40 }
 0x311   :  { %v997_v16 = vpop.permute.xlu1 %996 }
 0x312   :  { %v1038_v7 = vsub.f32 %v1808_v43, %v997_v16  ;;  %1519 = vpow2.f32 %v1059_v36  ;;  %v1041_v43 = vsub.f32 %v1901_v14, %v1012_v17  ;;  %vm344_vm5 = vcmp.eq.s32.totalorder %v326_v39, %v1705_v18 }
 0x313   :  { %1081 = vadd.xlane.f32.xlu0 %v1510_v54  ;;  %1521 = vpow2.f32 %v1057_v12  ;;  %v331_v17 = vadd.s32 56, %v1952_v40 }
 0x314   :  { %v1063_v38 = vmul.f32 1.442695, %v1038_v7  ;;  %v1516_v13 = vpop.eup %1515  ;;  %v325_v7 = vadd.s32 8, %v1952_v40 }
 0x315   :  { %v1007_v10 = vpop.permute.xlu1 %1006  ;;  %v1518_v45 = vpop.eup %1517  ;;  %vm349_vm8 = vcmp.eq.s32.totalorder %v331_v17, %v1705_v18  ;;  %v2178_v17 = vld [vmem:[#allocation24_spill] sm:$0xff] }
 0x316   :  { %v1040_v55 = vsub.f32 %v1822_v46, %v1007_v10  ;;  %1523 = vpow2.f32 %v1063_v38  ;;  %v1069_v46 = vmul.f32 1.442695, %v1041_v43  ;;  %vm343_vm3 = vcmp.eq.s32.totalorder %v325_v7, %v1705_v18 }
 0x317   :  { %1083 = vadd.xlane.f32.xlu0 %v1512_v50  ;;  %1525 = vpow2.f32 %v1061_v47  ;;  %v327_v47 = vadd.s32 24, %v1952_v40  ;;  %v328_v50 = vadd.s32 32, %v1952_v40  ;;  %v333_v43 = vadd.s32 72, %v1952_v40 }
 0x318   :  { %v1067_v24 = vmul.f32 1.442695, %v1040_v55  ;;  %1079 = vadd.xlane.f32.xlu1 %v1514_v41  ;;  %v330_v55 = vadd.s32 48, %v1952_v40 }
 0x319   :  { %v1017_v37 = vpop.permute.xlu1 %1016  ;;  %vm345_vm4 = vcmp.eq.s32.totalorder %v327_v47, %v1705_v18  ;;  %vm346_vm7 = vcmp.eq.s32.totalorder %v328_v50, %v1705_v18  ;;  %vm351_vm10 = vcmp.eq.s32.totalorder %v333_v43, %v1705_v18  ;;  %v920_v47 = vld [vmem:[#allocation3 + $0x18] sm:$0xff] }
 0x31a   :  { %v1042_v29 = vsub.f32 %v1832_v49, %v1017_v37  ;;  %1527 = vpow2.f32 %v1067_v24  ;;  %v361_v41 = vsel %vm345_vm4, %v1716_v23, 0.0  ;;  %v360_v24 = vsel %vm344_vm5, %v1708_v19, 0.0 }
 0x31b   :  { %1087 = vadd.xlane.f32.xlu0 %v1516_v13  ;;  %1529 = vpow2.f32 %v1065_v53  ;;  %vm348_vm9 = vcmp.eq.s32.totalorder %v330_v55, %v1705_v18  ;;  %v362_v53 = vsel %vm346_vm7, %v1744_v31, 0.0  ;;  %v332_v23 = vadd.s32 64, %v1952_v40  ;;  %v2179_v55 = vld [vmem:[#allocation23_spill] sm:$0xff] }
 0x31c   :  { %v1071_v1 = vmul.f32 1.442695, %v1042_v29  ;;  %1085 = vadd.xlane.f32.xlu1 %v1518_v45  ;;  %v1520_v61 = vpop.eup %1519  ;;  %v335_v19 = vadd.s32 88, %v1952_v40  ;;  %v365_v37 = vsel %vm349_vm8, %v1746_v32, 0.0  ;;  %v364_v13 = vsel %vm348_vm9, %v1741_v30, 0.0 }
 0x31d   :  { %v1522_v34 = vpop.eup %1521  ;;  %v334_v29 = vadd.s32 80, %v1952_v40  ;;  %v2169_v45 = vsub.f32 %v1850_v57, %v1855_v59  ;;  %v872_v31 = vsub.f32 %v1857_v60, %v1864_v63  ;;  %vm350_vm11 = vcmp.eq.s32.totalorder %v332_v23, %v1705_v18 }
 0x31e   :  { %1531 = vpow2.f32 %v1071_v1  ;;  %v870_v1 = vsub.f32 %v1837_v52, %v1847_v56  ;;  %vm353_vm12 = vcmp.eq.s32.totalorder %v335_v19, %v1705_v18  ;;  %v367_v30 = vsel %vm351_vm10, %v1728_v27, 0.0 }
 0x31f   :  { %1091 = vadd.xlane.f32.xlu0 %v1520_v61  ;;  %1533 = vpow2.f32 %v1069_v46  ;;  %v366_v32 = vsel %vm350_vm11, %v1714_v22, 0.0  ;;  %vm352_vm13 = vcmp.eq.s32.totalorder %v334_v29, %v1705_v18  ;;  %v337_v57 = vadd.s32 104, %v1952_v40 }
 0x320   :  { %1089 = vadd.xlane.f32.xlu1 %v1522_v34  ;;  %v1524_v28 = vpop.eup %1523  ;;  %v891_v59 = vmul.f32 1.442695, %v872_v31  ;;  %v874_v60 = vsub.f32 %v1873_v3, %v1878_v5  ;;  %v336_v63 = vadd.s32 96, %v1952_v40  ;;  %v887_v52 = vmul.f32 1.442695, %v870_v1 }
 0x321   :  { %v1526_v21 = vpop.eup %1525  ;;  %v873_v56 = vsub.f32 %v1866_v0, %v1871_v2  ;;  %v369_v27 = vsel %vm353_vm12, %v1723_v25, 0.0  ;;  %v368_v22 = vsel %vm352_vm13, %v1710_v20, 0.0  ;;  %vm355_vm14 = vcmp.eq.s32.totalorder %v337_v57, %v1705_v18 }
 0x322   :  { %v339_v46 = vadd.s32 120, %v1952_v40  ;;  %v895_v61 = vmul.f32 1.442695, %v874_v60  ;;  %v876_v3 = vsub.f32 %v1887_v9, %v1892_v11  ;;  %vm354_vm15 = vcmp.eq.s32.totalorder %v336_v63, %v1705_v18  ;;  %v2183_v60 = vld [vmem:[#allocation25_spill] sm:$0xff]  ;;  %v2184_v63 = vld [vmem:[#allocation26_spill] sm:$0xff] }
 0x323   :  { %1095 = vadd.xlane.f32.xlu0 %v1524_v28  ;;  %v893_v5 = vmul.f32 1.442695, %v873_v56  ;;  %v875_v0 = vsub.f32 %v1880_v6, %v1885_v8  ;;  %v338_v20 = vadd.s32 112, %v1952_v40  ;;  %v371_v25 = vsel %vm355_vm14, %v1827_v48, 0.0  ;;  %v2170_v28 = vld [vmem:[#allocation18_spill] sm:$0xff]  ;;  %v2171_v48 = vld [vmem:[#allocation15_spill] sm:$0xff] }
 0x324   :  { %1093 = vadd.xlane.f32.xlu1 %v1526_v21  ;;  %v1528_v14 = vpop.eup %1527  ;;  %v370_v2 = vsel %vm354_vm15, %v1810_v44, 0.0  ;;  %v899_v34 = vmul.f32 1.442695, %v876_v3  ;;  %v878_v9 = vsub.f32 %v2170_v28, %v1914_v51  ;;  %vm357_vm1 = vcmp.eq.s32.totalorder %v339_v46, %v1705_v18  ;;  %v2174_v51 = vld [vmem:[#allocation14_spill] sm:$0xff] }
 0x325   :  { %v1530_v42 = vpop.eup %1529  ;;  %v897_v11 = vmul.f32 1.442695, %v875_v0  ;;  %vm356_vm2 = vcmp.eq.s32.totalorder %v338_v20, %v1705_v18 }
 0x326   :  { %v903_v44 = vmul.f32 1.442695, %v878_v9 }
 0x327   :  { %1099 = vadd.xlane.f32.xlu0 %v1528_v14  ;;  %v373_v14 = vsel %vm357_vm1, %v2171_v48, 0.0 }
 0x328   :  { %1097 = vadd.xlane.f32.xlu1 %v1530_v42  ;;  %v1532_v49 = vpop.eup %1531  ;;  %v2172_v42 = vld [vmem:[#allocation22_spill] sm:$0xff] }
 0x329   :  { %v1534_v15 = vpop.eup %1533 }
 0x32b   :  { %1103 = vadd.xlane.f32.xlu0 %v1532_v49  ;;  %v2173_v49 = vld [vmem:[#allocation21_spill] sm:$0xff] }
 0x32c   :  { %1101 = vadd.xlane.f32.xlu1 %v1534_v15  ;;  %v880_v15 = vsub.f32 %v2173_v49, %v2172_v42 }
 0x32e   :  { %v907_v50 = vmul.f32 1.442695, %v880_v15 }
 0x36f   :  { %v1022_v36 = vpop.permute.xlu0 %1021 }
 0x370   :  { %v1043_v35 = vsub.f32 %v1948_v4, %v1022_v36  ;;  %v359_v4 = vsel %vm343_vm3, %v1726_v26, 0.0  ;;  %v372_v36 = vsel %vm356_vm2, %v2174_v51, 0.0 }
 0x372   :  { %v1073_v12 = vmul.f32 1.442695, %v1043_v35  ;;  %v2175_v35 = vld [vmem:[#allocation16_spill] sm:$0xff] }
 0x373   :  { %v1027_v16 = vpop.permute.xlu1 %1026 }
 0x374   :  { %1535 = vpow2.f32 %v1073_v12  ;;  %v1044_v54 = vsub.f32 %v1957_v62, %v1027_v16  ;;  %v329_v62 = vadd.s32 40, %v1952_v40  ;;  %v919_v40 = vld [vmem:[#allocation3 + $0x10] sm:$0xff]  ;;  %v2176_v12 = vld [vmem:[#allocation17_spill] sm:$0xff] }
 0x375   :  { %v2177_v16 = vsub.f32 %v2175_v35, %v2176_v12 }
 0x376   :  { %v1075_v58 = vmul.f32 1.442695, %v1044_v54  ;;  %vm347_vm6 = vcmp.eq.s32.totalorder %v329_v62, %v1705_v18  ;;  %v918_v62 = vld [vmem:[#allocation3 + $0x8] sm:$0xff] }
 0x377   :  { %v363_v26 = vsel %vm347_vm6, %v1748_v33, 0.0  ;;  %v889_v33 = vmul.f32 1.442695, %v2169_v45  ;;  %v901_v54 = vmul.f32 1.442695, %v2177_v16  ;;  %v922_v45 = vld [vmem:[#allocation3 + $0x28] sm:$0xff] }
 0x378   :  { %1537 = vpow2.f32 %v1075_v58 }
 0x379   :  { %1539 = vpow2.f32 %v889_v33 }
 0x37a   :  { %1541 = vpow2.f32 %v891_v59 }
 0x37b   :  { %1543 = vpow2.f32 %v887_v52  ;;  %v2185_v52 = vsub.f32 %v2183_v60, %v2184_v63 }
 0x37c   :  { %1545 = vpow2.f32 %v895_v61 }
 0x37d   :  { %1547 = vpow2.f32 %v893_v5  ;;  %v909_v56 = vmul.f32 1.442695, %v2185_v52  ;;  %v924_v5 = vld [vmem:[#allocation3 + $0x38] sm:$0xff] }
 0x37e   :  { %v1536_v38 = vpop.eup %1535  ;;  %1549 = vpow2.f32 %v899_v34 }
 0x37f   :  { %1105 = vadd.xlane.f32.xlu1 %v1536_v38  ;;  %1551 = vpow2.f32 %v897_v11 }
 0x380   :  { %1553 = vpow2.f32 %v903_v44 }
 0x381   :  { %1555 = vpow2.f32 %v901_v54  ;;  %v927_v54 = vld [vmem:[#allocation3 + $0x50] sm:$0xff] }
 0x382   :  { %v1538_v10 = vpop.eup %1537  ;;  %1557 = vpow2.f32 %v907_v50  ;;  %v929_v50 = vld [vmem:[#allocation3 + $0x60] sm:$0xff] }
 0x383   :  { %376 = vadd.xlane.f32.xlu1 %v359_v4  ;;  %1107 = vadd.xlane.f32.xlu0 %v1538_v10  ;;  %v1540_v6 = vpop.eup %1539 }
 0x384   :  { %v935_v18 = vmul.f32 %v1540_v6, %v919_v40  ;;  %v1542_v7 = vpop.eup %1541 }
 0x385   :  { %v1544_v39 = vpop.eup %1543  ;;  %v936_v23 = vmul.f32 %v1542_v7, %v920_v47 }
 0x386   :  { %v934_v29 = vmul.f32 %v1544_v39, %v918_v62  ;;  %v930_v39 = vld [vmem:[#allocation3 + $0x68] sm:$0xff] }
 0x387   :  { %380 = vadd.xlane.f32.xlu1 %v361_v41  ;;  %378 = vadd.xlane.f32.xlu0 %v360_v24  ;;  %v882_v41 = vsub.f32 %v2179_v55, %v2178_v17  ;;  %v2180_v24 = vld [vmem:[#allocation19_spill] sm:$0xff] }
 0x389   :  { %v911_v57 = vmul.f32 1.442695, %v882_v41 }
 0x38b   :  { %384 = vadd.xlane.f32.xlu1 %v363_v26  ;;  %382 = vadd.xlane.f32.xlu0 %v362_v53  ;;  %v2181_v26 = vld [vmem:[#allocation20_spill] sm:$0xff] }
 0x38c   :  { %v2182_v53 = vsub.f32 %v2180_v24, %v2181_v26 }
 0x38e   :  { %v905_v43 = vmul.f32 1.442695, %v2182_v53 }
 0x38f   :  { %388 = vadd.xlane.f32.xlu1 %v365_v37  ;;  %386 = vadd.xlane.f32.xlu0 %v364_v13  ;;  %v1546_v37 = vpop.eup %1545 }
 0x390   :  { %v1548_v33 = vpop.eup %1547  ;;  %1559 = vpow2.f32 %v905_v43 }
 0x391   :  { %v1550_v46 = vpop.eup %1549  ;;  %1561 = vpow2.f32 %v911_v57 }
 0x392   :  { %v1552_v0 = vpop.eup %1551  ;;  %1563 = vpow2.f32 %v909_v56  ;;  %v940_v28 = vmul.f32 %v1550_v46, %v924_v5 }
 0x393   :  { %392 = vadd.xlane.f32.xlu1 %v367_v30  ;;  %390 = vadd.xlane.f32.xlu0 %v366_v32  ;;  %v921_v30 = vld [vmem:[#allocation3 + $0x20] sm:$0xff]  ;;  %v1554_v9 = vpop.eup %1553 }
 0x394   :  { %v937_v3 = vmul.f32 %v1548_v33, %v921_v30  ;;  %v1556_v40 = vpop.eup %1555 }
 0x395   :  { %v1558_v49 = vpop.eup %1557 }
 0x397   :  { %396 = vadd.xlane.f32.xlu1 %v369_v27  ;;  %394 = vadd.xlane.f32.xlu0 %v368_v22  ;;  %v938_v27 = vmul.f32 %v1546_v37, %v922_v45 }
 0x39a   :  { %v1560_v35 = vpop.eup %1559 }
 0x39b   :  { %400 = vadd.xlane.f32.xlu1 %v371_v25  ;;  %398 = vadd.xlane.f32.xlu0 %v370_v2  ;;  %v923_v2 = vld [vmem:[#allocation3 + $0x30] sm:$0xff]  ;;  %v1562_v7 = vpop.eup %1561  ;;  %v943_v47 = vmul.f32 %v1560_v35, %v927_v54 }
 0x39c   :  { %v1369_v8 = vpop.xlane.xlu0 %1368  ;;  %v939_v6 = vmul.f32 %v1552_v0, %v923_v2  ;;  %v946_v55 = vmul.f32 %v1562_v7, %v930_v39 }
 0x39d   :  { %v1370_v21 = vrot.slane %v1369_v8, 4 }
 0x39f   :  { %v1371_v58 = vadd.f32 %v1370_v21, %v1369_v8  ;;  %404 = vadd.xlane.f32.xlu1 %v373_v14  ;;  %402 = vadd.xlane.f32.xlu0 %v372_v36  ;;  %v926_v8 = vld [vmem:[#allocation3 + $0x48] sm:$0xff]  ;;  %v925_v14 = vld [vmem:[#allocation3 + $0x40] sm:$0xff]  ;;  %v928_v36 = vld [vmem:[#allocation3 + $0x58] sm:$0xff] }
 0x3a0   :  { %v1082_v38 = vpop.xlane.xlu0 %1081  ;;  %v942_v42 = vmul.f32 %v1554_v9, %v926_v8  ;;  %v941_v51 = vmul.f32 %v1556_v40, %v925_v14 }
 0x3a1   :  { %v1372_v10 = vrot.slane %v1371_v58, 2  ;;  %v1111_v4 = vadd.f32 %v1082_v38, %v935_v18  ;;  %v944_v18 = vmul.f32 %v1558_v49, %v928_v36 }
 0x3a3   :  { %1128 = vst.msk [vmem:[#allocation3 + $0x10] sm:$0xff] %vm45_vm0, %v1111_v4  ;;  %v1373_v19 = vadd.f32 %v1372_v10, %v1371_v58  ;;  %v1564_v10 = vpop.eup %1563 }
 0x3a4   :  { %v1084_v13 = vpop.xlane.xlu0 %1083  ;;  %v945_v24 = vmul.f32 %v1564_v10, %v929_v50 }
 0x3a5   :  { %v1112_v31 = vadd.f32 %v1084_v13, %v936_v23  ;;  %v1080_v1 = vpop.xlane.xlu1 %1079  ;;  %v1374_v32 = vrot.slane %v1373_v19, 1 }
 0x3a6   :  { %v1110_v59 = vadd.f32 %v1080_v1, %v934_v29 }
 0x3a7   :  { %1129 = vst.msk [vmem:[#allocation3 + $0x18] sm:$0xff] %vm45_vm0, %v1112_v31  ;;  %v1375_v22 = vadd.f32 %v1374_v32, %v1373_v19 }
 0x3a8   :  { %1127 = vst.msk [vmem:[#allocation3 + $0x8] sm:$0xff] %vm45_vm0, %v1110_v59  ;;  %v1088_v61 = vpop.xlane.xlu0 %1087 }
 0x3a9   :  { %v1114_v20 = vadd.f32 %v1088_v61, %v938_v27  ;;  %v1086_v25 = vpop.xlane.xlu1 %1085  ;;  %1475 = vpush %v1375_v22 }
 0x3aa   :  { %v1113_v34 = vadd.f32 %v1086_v25, %v937_v3 }
 0x3ab   :  { %1131 = vst.msk [vmem:[#allocation3 + $0x28] sm:$0xff] %vm45_vm0, %v1114_v20 }
 0x3ac   :  { %1130 = vst.msk [vmem:[#allocation3 + $0x20] sm:$0xff] %vm45_vm0, %v1113_v34  ;;  %v1092_v11 = vpop.xlane.xlu0 %1091 }
 0x3ad   :  { %v1116_v21 = vadd.f32 %v1092_v11, %v940_v28  ;;  %v1090_v48 = vpop.xlane.xlu1 %1089 }
 0x3ae   :  { %v1115_v44 = vadd.f32 %v1090_v48, %v939_v6 }
 0x3af   :  { %1133 = vst.msk [vmem:[#allocation3 + $0x38] sm:$0xff] %vm45_vm0, %v1116_v21 }
 0x3b0   :  { %1132 = vst.msk [vmem:[#allocation3 + $0x30] sm:$0xff] %vm45_vm0, %v1115_v44  ;;  %v1096_v15 = vpop.xlane.xlu0 %1095 }
 0x3b1   :  { %v1118_v12 = vadd.f32 %v1096_v15, %v942_v42  ;;  %v1094_v16 = vpop.xlane.xlu1 %1093 }
 0x3b2   :  { %v1117_v58 = vadd.f32 %v1094_v16, %v941_v51 }
 0x3b3   :  { %1135 = vst.msk [vmem:[#allocation3 + $0x48] sm:$0xff] %vm45_vm0, %v1118_v12 }
 0x3b4   :  { %1134 = vst.msk [vmem:[#allocation3 + $0x40] sm:$0xff] %vm45_vm0, %v1117_v58  ;;  %v1100_v38 = vpop.xlane.xlu0 %1099 }
 0x3b5   :  { %v1120_v4 = vadd.f32 %v1100_v38, %v944_v18  ;;  %v1098_v62 = vpop.xlane.xlu1 %1097 }
 0x3b6   :  { %v1119_v17 = vadd.f32 %v1098_v62, %v943_v47 }
 0x3b7   :  { %1137 = vst.msk [vmem:[#allocation3 + $0x58] sm:$0xff] %vm45_vm0, %v1120_v4 }
 0x3b8   :  { %1136 = vst.msk [vmem:[#allocation3 + $0x50] sm:$0xff] %vm45_vm0, %v1119_v17  ;;  %v1104_v41 = vpop.xlane.xlu0 %1103 }
 0x3b9   :  { %v1122_v26 = vadd.f32 %v1104_v41, %v946_v55  ;;  %v1102_v53 = vpop.xlane.xlu1 %1101 }
 0x3ba   :  { %v1121_v43 = vadd.f32 %v1102_v53, %v945_v24 }
 0x3bb   :  { %1139 = vst.msk [vmem:[#allocation3 + $0x68] sm:$0xff] %vm45_vm0, %v1122_v26 }
 0x3bc   :  { %1138 = vst.msk [vmem:[#allocation3 + $0x60] sm:$0xff] %vm45_vm0, %v1121_v43 }
 0x3da   :  { %s1476_s7 = spop %1475 }
 0x3db   :  { %v1377_v23 = vstv %s1476_s7 }
 0x3dc   :  { %1378 = vst [vmem:[#allocation10] sm:$0x1] %v1377_v23 }
 0x3dd   :  { %1624 = shalt.err (!%p1621_p6)
}
 0x3de   :  { %s1625_s12 = scalar_lea.hbm %s2133_s2, 16 }
 0x3df   :  { %p1626_p7 = scmp.ne.s32.totalorder %s2133_s2, %s1625_s12  ;;  %p1629_p8 = scmp.lt.u32.totalorder %s1625_s12, %s2133_s2 }
 0x3e1   :  { %p1631_p9 = pnand %p1629_p8, %p1626_p7 }
 0x3e3   :  { %1634 = shalt.err (!%p1631_p9)
}
 0x3e4   :  { %1388 = dma.vmem_to_hbm [thread:$0]  %s1386_s6, 16, %s2133_s2, [#allocation7]   ;;  %v2186_v19 = vld [vmem:[#allocation27_spill] sm:$0xff]  ;;  %v2187_v37 = vld [vmem:[#allocation28_spill] sm:$0xff]  ;;  %v2189_v45 = vld [vmem:[#allocation29_spill] sm:$0xff] }
 0x3e5   :  { %v2188_v13 = vsub.f32 %v2186_v19, %v2187_v37  ;;  %v2190_v33 = vld [vmem:[#allocation30_spill] sm:$0xff]  ;;  %v931_v32 = vld [vmem:[#allocation3 + $0x70] sm:$0xff]  ;;  %v932_v63 = vld [vmem:[#allocation3 + $0x78] sm:$0xff] }
 0x3e6   :  { %v2191_v31 = vsub.f32 %v2189_v45, %v2190_v33 }
 0x3e7   :  { %v913_v29 = vmul.f32 1.442695, %v2188_v13 }
 0x3e8   :  { %v915_v1 = vmul.f32 1.442695, %v2191_v31 }
 0x3e9   :  { %1565 = vpow2.f32 %v913_v29 }
 0x3ea   :  { %1567 = vpow2.f32 %v915_v1 }
 0x3f3   :  { %v1566_v30 = vpop.eup %1565 }
 0x3f4   :  { %v947_v57 = vmul.f32 %v1566_v30, %v931_v32  ;;  %v1568_v59 = vpop.eup %1567 }
 0x3f5   :  { %v948_v56 = vmul.f32 %v1568_v59, %v932_v63 }
 0x40c   :  { %v1106_v60 = vpop.xlane.xlu1 %1105 }
 0x40d   :  { %v1123_v52 = vadd.f32 %v1106_v60, %v947_v57 }
 0x40f   :  { %1140 = vst.msk [vmem:[#allocation3 + $0x70] sm:$0xff] %vm45_vm0, %v1123_v52 }
 0x410   :  { %v377_v27 = vpop.xlane.xlu1 %376  ;;  %v1108_v22 = vpop.xlane.xlu0 %1107 }
 0x411   :  { %v1124_v46 = vadd.f32 %v1108_v22, %v948_v56 }
 0x413   :  { %1141 = vst.msk [vmem:[#allocation3 + $0x78] sm:$0xff] %vm45_vm0, %v1124_v46 }
 0x414   :  { %v381_v61 = vpop.xlane.xlu1 %380  ;;  %v379_v3 = vpop.xlane.xlu0 %378 }
 0x418   :  { %v385_v5 = vpop.xlane.xlu1 %384  ;;  %v383_v0 = vpop.xlane.xlu0 %382 }
 0x41c   :  { %v389_v20 = vpop.xlane.xlu1 %388  ;;  %v387_v25 = vpop.xlane.xlu0 %386 }
 0x420   :  { %v393_v2 = vpop.xlane.xlu1 %392  ;;  %v391_v34 = vpop.xlane.xlu0 %390 }
 0x424   :  { %v397_v28 = vpop.xlane.xlu1 %396  ;;  %v395_v9 = vpop.xlane.xlu0 %394 }
 0x428   :  { %v401_v11 = vpop.xlane.xlu1 %400  ;;  %v399_v6 = vpop.xlane.xlu0 %398 }
 0x42c   :  { %v405_v8 = vpop.xlane.xlu1 %404  ;;  %v403_v40 = vpop.xlane.xlu0 %402 }
 0x42d   :  { %1639 = dma.done.wait [#allocation7], 16  }
 0x42e   :  { %1640 = vsyncadd [#allocation7], 4294967280 }
 0x42f   :  { %1392 = vsyncpa [#allocation6], 1 }
 0x430   :  { %1393 = vsyncpa [#allocation9], 1 }
 0x431   :  { %1394 = vsyncpa [#allocation7], 1 }

</bundles_post_ra>
